<compile_context>
chip_gen: v6e
topology: v6e:2x2x1
jax: 0.10.0
libtpu: 0.0.40
codegen_flags: <defaults>
</compile_context>

<pallas_src>
import functools

import jax
import jax.numpy as jnp
from jax import lax
from jax.experimental import pallas as pl
from jax.experimental.pallas import tpu as pltpu

MAX_UNIT_SIZE = 800   # HeadcountEffect default max_unit_size
N_MLP = 64            # hidden width of the MLP (nn.Linear(hidden_dim, 64))


def _round_up(x, m):
    return (x + m - 1) // m * m


# ----------------------------------------------------------------------------
# Kernel
# ----------------------------------------------------------------------------
def suppression_kernel(bc_ref, chest_t_ref, a_ref, d_ref,
                       b1_ref, w2_ref, b2_ref,
                       out_ref, macc_ref):
    """Grid = (attack-unit blocks, defend-unit blocks).

    bc_ref      (N_MLP, tu_a, H) bf16  blade[u,h]*w1[h,c]  (hoisted, per-gi)
    chest_t_ref (H, tu_d)        bf16  chest embeddings, transposed (per-gj)
    a_ref       (tu_a, B_pad)    f32   attack head-count utility (per-gi)
    d_ref       (tu_d, B_pad)    bf16  defend head-count utility (per-gj)
    b1/w2/b2    SMEM f32 (N_MLP,)/(N_MLP,)/(1,)
    out_ref     (1, 1, B_pad)    f32   per-attack-block partial sum
    macc_ref    (tu_a, B_pad)    f32   scratch: sum_v s[u,v]*d_util[v,b]
    """
    gj = pl.program_id(1)
    n_gj = pl.num_programs(1)

    @pl.when(gj == 0)
    def _():
        macc_ref[...] = jnp.zeros_like(macc_ref)

    n_mlp, tu_a, _ = bc_ref.shape
    chest_t = chest_t_ref[...]                       # (H, tu_d) bf16
    tu_d = chest_t.shape[1]

    # MLP layer-1 + layer-2 with the blade side hoisted:
    #   h1_c[u,v] = sum_h (blade[u,h]*w1[h,c]) * chest[v,h]     (MXU, bf16)
    #   s_pre[u,v] = sum_c w2[c] * relu(h1_c[u,v] + b1[c])      (VPU FMA)
    def mlp_step(c, s_pre):
        z = jnp.dot(bc_ref[c], chest_t, preferred_element_type=jnp.float32)
        return s_pre + w2_ref[c] * jnp.maximum(z + b1_ref[c], 0.0)

    s_pre = lax.fori_loop(0, n_mlp, mlp_step,
                          jnp.zeros((tu_a, tu_d), jnp.float32))
    # Dropout(0.2) is identity at inference; final ReLU of the MLP:
    s_mat = jnp.maximum(s_pre + b2_ref[0], 0.0)      # (tu_a, tu_d) f32

    # Defend-side head-count weighting, accumulated across the gj sweep
    # (lane-dense N = B_pad matmul, bf16 inputs, f32 accumulate).
    macc_ref[...] += jnp.dot(s_mat.astype(jnp.bfloat16), d_ref[...],
                             preferred_element_type=jnp.float32)

    # Attack-side weighting + single lane-dense store per attack block.
    @pl.when(gj == n_gj - 1)
    def _():
        contrib = jnp.sum(a_ref[...] * macc_ref[...], axis=0, keepdims=True)
        out_ref[...] = contrib[None]                 # (1, 1, B_pad)


# ----------------------------------------------------------------------------
# Parameters (match PyTorch defaults / module init)
# ----------------------------------------------------------------------------
def init_params(key, n_unit, hidden_dim):
    k1, k2, k3, k4, k5, k6 = jax.random.split(key, 6)
    # nn.Embedding default init: N(0, 1)
    blade = jax.random.normal(k1, (n_unit, hidden_dim), jnp.float32)
    chest = jax.random.normal(k2, (n_unit, hidden_dim), jnp.float32)
    # nn.Linear default init: U(-1/sqrt(fan_in), 1/sqrt(fan_in))
    lim1 = 1.0 / float(hidden_dim) ** 0.5
    w1 = jax.random.uniform(k3, (hidden_dim, N_MLP), jnp.float32, -lim1, lim1)
    b1 = jax.random.uniform(k4, (N_MLP,), jnp.float32, -lim1, lim1)
    lim2 = 1.0 / float(N_MLP) ** 0.5
    w2 = jax.random.uniform(k5, (N_MLP,), jnp.float32, -lim2, lim2)
    b2 = jax.random.uniform(k6, (1,), jnp.float32, -lim2, lim2)
    # HeadcountEffect (mode=3) embedding tables: weights all set to 0.5
    attack_embed = jnp.full((MAX_UNIT_SIZE * n_unit, 1), 0.5, jnp.float32)
    defend_embed = jnp.full((MAX_UNIT_SIZE * n_unit, 1), 0.5, jnp.float32)
    return dict(blade=blade, chest=chest, w1=w1, b1=b1, w2=w2, b2=b2,
                attack_embed=attack_embed, defend_embed=defend_embed)


def _headcount_utility(embed_w, counts, n_unit):
    # HeadcountEffect mode=3: relu(embed[count + unit*max_size]) * (count != 0)
    # TODO(synk): data-dependent embedding gather kept in plain JAX.
    shift = jnp.arange(n_unit, dtype=jnp.int32) * MAX_UNIT_SIZE
    util = jnp.maximum(embed_w[counts + shift[None, :], 0], 0.0)
    return util * (counts != 0).astype(jnp.float32)          # (B, n_unit)


def _hoisted_blade_w1(blade, w1):
    # bc[c, u, h] = blade[u, h] * w1[h, c]   (bf16; shared by kernel & ref)
    blade_bf = blade.astype(jnp.bfloat16)
    w1t_bf = w1.astype(jnp.bfloat16).T                       # (N_MLP, H)
    return blade_bf[None, :, :] * w1t_bf[:, None, :]         # (N_MLP, n, H)


# ----------------------------------------------------------------------------
# Forward wrapper
# ----------------------------------------------------------------------------
def suppression_forward(params, team_A, team_B, *, tu_a=None, tu_d=None):
    n_unit, hidden_dim = params["blade"].shape
    batch = team_A.shape[0]

    # Head-count utilities (values in {0, 0.5}).
    a_util = _headcount_utility(params["attack_embed"], team_A, n_unit)
    d_util = _headcount_utility(params["defend_embed"], team_B, n_unit)

    # ---- tile selection ----------------------------------------------------
    # batch padded to 128 lanes (dense stores + lane-dense second matmul);
    # tu_d is a lane dim (multiple of 128 or full extent); tu_a is a sublane
    # dim (multiple of 16 for bf16) and is split in two for small unit counts
    # so both v7x TensorCores get work along the "parallel" grid axis.
    b_pad = _round_up(batch, 128)
    n16 = _round_up(n_unit, 16)
    if tu_d is None:
        tu_d = n16 if n16 <= 256 else 128
    if tu_a is None:
        if n16 <= 32:
            tu_a = n16
        elif n16 <= 256:
            tu_a = _round_up((n16 + 1) // 2, 16)     # -> n_gi == 2
        else:
            tu_a = 128
    n_pad_a = _round_up(n_unit, tu_a)
    n_pad_d = _round_up(n_unit, tu_d)
    assert tu_a % 16 == 0 and n_pad_a % tu_a == 0
    assert (tu_d % 128 == 0) or (tu_d == n_pad_d)
    n_gi = n_pad_a // tu_a
    n_gj = n_pad_d // tu_d

    # ---- kernel operands (zero-padded so padded units / batch cols give 0) --
    bc = _hoisted_blade_w1(params["blade"], params["w1"])     # (64, n, H) bf16
    bc = jnp.pad(bc, ((0, 0), (0, n_pad_a - n_unit), (0, 0)))
    chest_t = params["chest"].astype(jnp.bfloat16).T          # (H, n) bf16
    chest_t = jnp.pad(chest_t, ((0, 0), (0, n_pad_d - n_unit)))
    a_util_t = jnp.pad(a_util.T, ((0, n_pad_a - n_unit), (0, b_pad - batch)))
    d_util_t = jnp.pad(d_util.T.astype(jnp.bfloat16),
                       ((0, n_pad_d - n_unit), (0, b_pad - batch)))

    grid_spec = pltpu.PrefetchScalarGridSpec(
        num_scalar_prefetch=0,
        grid=(n_gi, n_gj),
        in_specs=[
            pl.BlockSpec((N_MLP, tu_a, hidden_dim), lambda gi, gj: (0, gi, 0)),
            pl.BlockSpec((hidden_dim, tu_d), lambda gi, gj: (0, gj)),
            pl.BlockSpec((tu_a, b_pad), lambda gi, gj: (gi, 0)),
            pl.BlockSpec((tu_d, b_pad), lambda gi, gj: (gj, 0)),
            pl.BlockSpec(memory_space=pltpu.MemorySpace.SMEM),   # b1
            pl.BlockSpec(memory_space=pltpu.MemorySpace.SMEM),   # w2
            pl.BlockSpec(memory_space=pltpu.MemorySpace.SMEM),   # b2
        ],
        out_specs=pl.BlockSpec((1, 1, b_pad), lambda gi, gj: (gi, 0, 0)),
        scratch_shapes=[pltpu.VMEM((tu_a, b_pad), jnp.float32)],
    )

    block_out = pl.pallas_call(
        suppression_kernel,
        out_shape=jax.ShapeDtypeStruct((n_gi, 1, b_pad), jnp.float32),
        grid_spec=grid_spec,
        compiler_params=pltpu.CompilerParams(
            dimension_semantics=("parallel", "arbitrary")),
    )(bc, chest_t, a_util_t, d_util_t,
      params["b1"], params["w2"], params["b2"])

    # Sum the per-attack-block partials and drop the batch padding.
    return jnp.sum(block_out[:, 0, :batch], axis=0)           # (batch,)


# ----------------------------------------------------------------------------
# Pure-JAX reference (mirrors the module semantics and the kernel's bf16
# casting points, so a tight tolerance is meaningful).
# ----------------------------------------------------------------------------
def reference_forward(params, team_A, team_B):
    n_unit, _ = params["blade"].shape
    a_util = _headcount_utility(params["attack_embed"], team_A, n_unit)  # (B,n)
    d_util = _headcount_utility(params["defend_embed"], team_B, n_unit)  # (B,n)

    bc = _hoisted_blade_w1(params["blade"], params["w1"])                # (64,n,H)
    chest_bf = params["chest"].astype(jnp.bfloat16)                      # (n,H)
    h1 = jnp.einsum("cuh,vh->cuv", bc, chest_bf,
                    preferred_element_type=jnp.float32)                  # (64,n,n)
    relu_h1 = jnp.maximum(h1 + params["b1"][:, None, None], 0.0)
    s_pre = jnp.einsum("c,cuv->uv", params["w2"], relu_h1)
    s = jnp.maximum(s_pre + params["b2"][0], 0.0)                        # (n,n)

    m = jnp.einsum("uv,bv->ub", s.astype(jnp.bfloat16),
                   d_util.astype(jnp.bfloat16),
                   preferred_element_type=jnp.float32)                   # (n,B)
    return jnp.sum(a_util.T * m, axis=0)                                 # (B,)


if __name__ == "__main__":
    key = jax.random.PRNGKey(0)

    configs = [
        # Small default-tiled case: exercises unit/batch padding, n_gi=n_gj=1.
        (12, 32, 4, {}),
        # Multi-block case: n_gi=4, n_gj=2 — exercises the defend-axis
        # accumulation in VMEM scratch and the per-attack-block partial sums.
        (200, 32, 8, dict(tu_a=64, tu_d=128)),
    ]
    for n_unit, hidden_dim, batch, tiles in configs:
        key, pkey, akey, bkey = jax.random.split(key, 4)
        params = init_params(pkey, n_unit, hidden_dim)
        team_A = jax.random.randint(akey, (batch, n_unit), 0, MAX_UNIT_SIZE,
                                    dtype=jnp.int32)
        team_B = jax.random.randint(bkey, (batch, n_unit), 0, MAX_UNIT_SIZE,
                                    dtype=jnp.int32)

        fwd = jax.jit(functools.partial(suppression_forward, **tiles))
        out = fwd(params, team_A, team_B)
        jax.block_until_ready(out)

        ref = reference_forward(params, team_A, team_B)
        assert out.shape == (batch,)
        assert bool(jnp.allclose(out, ref, rtol=2e-3, atol=2e-3)), \
            (n_unit, out, ref)
    print("KERNEL_OK")
</pallas_src>

<mosaic_0001>
module attributes {stable_mosaic.version = 11 : i64} {
  func.func @suppression_kernel(%arg0: i32, %arg1: i32, %arg2: memref<64x16x32xbf16, #tpu.memory_space<vmem>>, %arg3: memref<32x16xbf16, #tpu.memory_space<vmem>>, %arg4: memref<16x128xf32, #tpu.memory_space<vmem>>, %arg5: memref<16x128xbf16, #tpu.memory_space<vmem>>, %arg6: memref<64xf32, #tpu.memory_space<smem>>, %arg7: memref<64xf32, #tpu.memory_space<smem>>, %arg8: memref<1xf32, #tpu.memory_space<smem>>, %arg9: memref<1x1x128xf32, #tpu.memory_space<vmem>>, %arg10: memref<16x128xf32, #tpu.memory_space<vmem>>) attributes {dimension_semantics = [#tpu.dimension_semantics<parallel>, #tpu.dimension_semantics<arbitrary>], iteration_bounds = array<i64: 1, 1>, scalar_prefetch = 0 : i64, scratch_operands = 1 : i64, tpu.core_type = #tpu.core_type<tc>, window_params = [{transform_indices = @transform_0, window_bounds = array<i64: 64, 16, 32>}, {transform_indices = @transform_1, window_bounds = array<i64: 32, 16>}, {transform_indices = @transform_2, window_bounds = array<i64: 16, 128>}, {transform_indices = @transform_3, window_bounds = array<i64: 16, 128>}, {transform_indices = @transform_4, window_bounds = array<i64: 64>}, {transform_indices = @transform_5, window_bounds = array<i64: 64>}, {transform_indices = @transform_6, window_bounds = array<i64: 1>}, {transform_indices = @transform_7, window_bounds = array<i64: 1, 1, 128>}]} {
    %c0_i32 = arith.constant 0 : i32
    %0 = arith.cmpi eq, %arg1, %c0_i32 : i32
    %1 = arith.extui %0 : i1 to i32
    %c0_i32_0 = arith.constant 0 : i32
    %2 = arith.cmpi ne, %1, %c0_i32_0 : i32
    scf.if %2 {
      %cst_15 = arith.constant 0.000000e+00 : f32
      %21 = vector.broadcast %cst_15 : f32 to vector<16x128xf32>
      %c0_16 = arith.constant 0 : index
      %c0_17 = arith.constant 0 : index
      %22 = vector.load %arg10[%c0_16, %c0_17] : memref<16x128xf32, #tpu.memory_space<vmem>>, vector<16x128xf32>
      tpu.vector_store %arg10[%c0_16, %c0_17], %21 {strides = array<i32>} : memref<16x128xf32, #tpu.memory_space<vmem>>, vector<16x128xf32>,
    } else {
    }
    %c0 = arith.constant 0 : index
    %c0_1 = arith.constant 0 : index
    %3 = vector.load %arg3[%c0, %c0_1] : memref<32x16xbf16, #tpu.memory_space<vmem>>, vector<32x16xbf16>
    %cst = arith.constant 0.000000e+00 : f32
    %4 = vector.broadcast %cst : f32 to vector<16x16xf32>
    %c0_i32_2 = arith.constant 0 : i32
    %c64_i32 = arith.constant 64 : i32
    %5 = arith.addi %c0_i32_2, %c64_i32 : i32
    %c1_i32 = arith.constant 1 : i32
    %6 = scf.for %arg11 = %c0_i32_2 to %5 step %c1_i32 iter_args(%arg12 = %4) -> (vector<16x16xf32>)  : i32 {
      %21 = arith.index_cast %arg11 : i32 to index
      %c0_15 = arith.constant 0 : index
      %c0_16 = arith.constant 0 : index
      %22 = vector.load %arg2[%21, %c0_15, %c0_16] : memref<64x16x32xbf16, #tpu.memory_space<vmem>>, vector<1x16x32xbf16>
      %23 = vector.shape_cast %22 : vector<1x16x32xbf16> to vector<16x32xbf16>
      %cst_17 = arith.constant dense<0.000000e+00> : vector<16x16xf32>
      %24 = tpu.matmul %23, %3, %cst_17 {dimension_numbers = #tpu.dot_dimension_numbers<[1], [0], [0], [1], [0, 0, 1, 1], [], []>} : vector<16x32xbf16>, vector<32x16xbf16>, vector<16x16xf32> -> vector<16x16xf32>
      %25 = arith.index_cast %arg11 : i32 to index
      %26 = memref.load %arg7[%25] : memref<64xf32, #tpu.memory_space<smem>>
      %27 = arith.index_cast %arg11 : i32 to index
      %28 = memref.load %arg6[%27] : memref<64xf32, #tpu.memory_space<smem>>
      %29 = vector.broadcast %28 : f32 to vector<16x16xf32>
      %30 = arith.addf %24, %29 : vector<16x16xf32>
      %cst_18 = arith.constant 0.000000e+00 : f32
      %31 = vector.broadcast %cst_18 : f32 to vector<16x16xf32>
      %32 = arith.maximumf %30, %31 : vector<16x16xf32>
      %33 = vector.broadcast %26 : f32 to vector<16x16xf32>
      %34 = arith.mulf %33, %32 : vector<16x16xf32>
      %35 = arith.addf %arg12, %34 : vector<16x16xf32>
      scf.yield %35 : vector<16x16xf32>
    }
    %c64_i32_3 = arith.constant 64 : i32
    %c0_4 = arith.constant 0 : index
    %7 = memref.load %arg8[%c0_4] : memref<1xf32, #tpu.memory_space<smem>>
    %8 = vector.broadcast %7 : f32 to vector<16x16xf32>
    %9 = arith.addf %6, %8 : vector<16x16xf32>
    %cst_5 = arith.constant 0.000000e+00 : f32
    %10 = vector.broadcast %cst_5 : f32 to vector<16x16xf32>
    %11 = arith.maximumf %9, %10 : vector<16x16xf32>
    %c0_6 = arith.constant 0 : index
    %c0_7 = arith.constant 0 : index
    %12 = vector.load %arg10[%c0_6, %c0_7] : memref<16x128xf32, #tpu.memory_space<vmem>>, vector<16x128xf32>
    %13 = arith.truncf %11 : vector<16x16xf32> to vector<16x16xbf16>
    %c0_8 = arith.constant 0 : index
    %c0_9 = arith.constant 0 : index
    %14 = vector.load %arg5[%c0_8, %c0_9] : memref<16x128xbf16, #tpu.memory_space<vmem>>, vector<16x128xbf16>
    %cst_10 = arith.constant dense<0.000000e+00> : vector<16x128xf32>
    %15 = tpu.matmul %13, %14, %cst_10 {dimension_numbers = #tpu.dot_dimension_numbers<[1], [0], [0], [1], [0, 0, 1, 1], [], []>} : vector<16x16xbf16>, vector<16x128xbf16>, vector<16x128xf32> -> vector<16x128xf32>
    %16 = arith.addf %12, %15 : vector<16x128xf32>
    %c0_11 = arith.constant 0 : index
    %c0_12 = arith.constant 0 : index
    %17 = vector.load %arg10[%c0_11, %c0_12] : memref<16x128xf32, #tpu.memory_space<vmem>>, vector<16x128xf32>
    tpu.vector_store %arg10[%c0_11, %c0_12], %16 {strides = array<i32>} : memref<16x128xf32, #tpu.memory_space<vmem>>, vector<16x128xf32>,
    %c0_i32_13 = arith.constant 0 : i32
    %18 = arith.cmpi eq, %arg1, %c0_i32_13 : i32
    %19 = arith.extui %18 : i1 to i32
    %c0_i32_14 = arith.constant 0 : i32
    %20 = arith.cmpi ne, %19, %c0_i32_14 : i32
    scf.if %20 {
      %c0_15 = arith.constant 0 : index
      %c0_16 = arith.constant 0 : index
      %21 = vector.load %arg4[%c0_15, %c0_16] : memref<16x128xf32, #tpu.memory_space<vmem>>, vector<16x128xf32>
      %c0_17 = arith.constant 0 : index
      %c0_18 = arith.constant 0 : index
      %22 = vector.load %arg10[%c0_17, %c0_18] : memref<16x128xf32, #tpu.memory_space<vmem>>, vector<16x128xf32>
      %23 = arith.mulf %21, %22 : vector<16x128xf32>
      %cst_19 = arith.constant dense<0.000000e+00> : vector<128xf32>
      %24 = vector.multi_reduction <add>, %23, %cst_19 [0] : vector<16x128xf32> to vector<128xf32>
      %25 = vector.shape_cast %24 : vector<128xf32> to vector<1x128xf32>
      %26 = vector.shape_cast %25 : vector<1x128xf32> to vector<1x1x128xf32>
      %c0_20 = arith.constant 0 : index
      %c0_21 = arith.constant 0 : index
      %c0_22 = arith.constant 0 : index
      %27 = vector.load %arg9[%c0_20, %c0_21, %c0_22] : memref<1x1x128xf32, #tpu.memory_space<vmem>>, vector<1x1x128xf32>
      tpu.vector_store %arg9[%c0_20, %c0_21, %c0_22], %26 {strides = array<i32>} : memref<1x1x128xf32, #tpu.memory_space<vmem>>, vector<1x1x128xf32>,
    } else {
    }
    return
  }
  func.func @transform_0(%arg0: i32, %arg1: i32) -> (i32, i32, i32) {
    %c0_i32 = arith.constant 0 : i32
    %c0_i32_0 = arith.constant 0 : i32
    %c0_i32_1 = arith.constant 0 : i32
    return %c0_i32, %arg0, %c0_i32_0 : i32, i32, i32
  }
  func.func @transform_1(%arg0: i32, %arg1: i32) -> (i32, i32) {
    %c0_i32 = arith.constant 0 : i32
    %c0_i32_0 = arith.constant 0 : i32
    return %c0_i32, %arg1 : i32, i32
  }
  func.func @transform_2(%arg0: i32, %arg1: i32) -> (i32, i32) {
    %c0_i32 = arith.constant 0 : i32
    %c0_i32_0 = arith.constant 0 : i32
    return %arg0, %c0_i32 : i32, i32
  }
  func.func @transform_3(%arg0: i32, %arg1: i32) -> (i32, i32) {
    %c0_i32 = arith.constant 0 : i32
    %c0_i32_0 = arith.constant 0 : i32
    return %arg1, %c0_i32 : i32, i32
  }
  func.func @transform_4(%arg0: i32, %arg1: i32) -> i32 {
    %c0_i32 = arith.constant 0 : i32
    %c0_i32_0 = arith.constant 0 : i32
    return %c0_i32 : i32
  }
  func.func @transform_5(%arg0: i32, %arg1: i32) -> i32 {
    %c0_i32 = arith.constant 0 : i32
    %c0_i32_0 = arith.constant 0 : i32
    return %c0_i32 : i32
  }
  func.func @transform_6(%arg0: i32, %arg1: i32) -> i32 {
    %c0_i32 = arith.constant 0 : i32
    %c0_i32_0 = arith.constant 0 : i32
    return %c0_i32 : i32
  }
  func.func @transform_7(%arg0: i32, %arg1: i32) -> (i32, i32, i32) {
    %c0_i32 = arith.constant 0 : i32
    %c0_i32_0 = arith.constant 0 : i32
    %c0_i32_1 = arith.constant 0 : i32
    return %arg0, %c0_i32, %c0_i32_0 : i32, i32, i32
  }
}

</mosaic_0001>

<bundles_post_ra>
// kernel: suppression_forward.1
= control target key start
LH: loop header
LB: loop body
LE: loop exit
PB: predicated region body
PF: predicated region fallthrough
CT: control target
= control target key end

     0   :  { %s455_s0 = inlined_call_operand.vmem [shape: bf16[64,16,32], index: 0, kind: input, shape index: {}]   ;;  %s456_s1 = inlined_call_operand.vmem [shape: bf16[32,16], index: 1, kind: input, shape index: {}]   ;;  %s457_s2 = inlined_call_operand.vmem [shape: f32[16,128], index: 2, kind: input, shape index: {}]   ;;  %s458_s3 = inlined_call_operand.vmem [shape: bf16[16,128], index: 3, kind: input, shape index: {}]   ;;  %s459_s4 = inlined_call_operand.vmem [shape: f32[64], index: 4, kind: input, shape index: {}]   ;;  %s460_s5 = inlined_call_operand.vmem [shape: f32[64], index: 5, kind: input, shape index: {}]   ;;  %s461_s6 = inlined_call_operand.<no memory space> [shape: f32[1], index: 6, kind: input, shape index: {}]   ;;  %s462_s7 = inlined_call_operand.vmem [shape: f32[1,1,128], index: 7, kind: output, shape index: {}]  }
   0x1   :  { %12 = sst [smem:[#allocation3]] %s461_s6 }
   0x2   :  { %13 = vsyncpa [#allocation5], 0  ;;  %s29_s28 = sshll.u32 %s459_s4, 4  ;;  %s30_s28 = int_to_ptr.vmem [resolvable:$true] %s29_s28 }
   0x3   :  { %14 = vsyncpa [#allocation7], 0  ;;  %s39_s8 = sshll.u32 %s460_s5, 4  ;;  %s310_s9 = scalar_lea.vmem %s30_s28, 16  ;;  %s40_s8 = int_to_ptr.vmem [resolvable:$true] %s39_s8 }
   0x4   :  { %p311_p0 = scmp.ne.s32.totalorder %s30_s28, %s310_s9  ;;  %p315_p1 = scmp.lt.s32.totalorder %s30_s28, %s30_s28 }
   0x5   :  { %p316_p2 = scmp.lt.s32.totalorder %s310_s9, %s310_s9 }
   0x7   :  { %p317_p3 = por %p316_p2, %p315_p1 }
   0x9   :  { %p318_p4 = pnand %p317_p3, %p311_p0 }
   0xb   :  { %321 = shalt.err (!%p318_p4)
}
   0xc   :  { %s362_s10 = smov [#allocation4]   ;;  %s322_s6 = scalar_lea.vmem %s40_s8, 16 }
   0xd   :  { %32 = dma.vmem_to_smem %s30_s28, 16, %s362_s10, [#allocation5]  }
   0xe   :  { %p323_p5 = scmp.ne.s32.totalorder %s40_s8, %s322_s6  ;;  %p327_p6 = scmp.lt.s32.totalorder %s40_s8, %s40_s8 }
   0xf   :  { %p328_p7 = scmp.lt.s32.totalorder %s322_s6, %s322_s6 }
  0x11   :  { %p329_p8 = por %p328_p7, %p327_p6 }
  0x13   :  { %p330_p9 = pnand %p329_p8, %p323_p5 }
  0x15   :  { %333 = shalt.err (!%p330_p9)
}
  0x16   :  { %s363_s4 = smov [#allocation6]  }
  0x17   :  { %42 = dma.vmem_to_smem %s40_s8, 16, %s363_s4, [#allocation7]  }
  0x18   :  { %346 = dma.done.wait [#allocation5], 16  }
  0x19   :  { %347 = vsyncadd [#allocation5], 4294967280 }
  0x1a   :  { %348 = dma.done.wait [#allocation7], 16  }
  0x1b   :  { %349 = vsyncadd [#allocation7], 4294967280 }
  0x1c   :  { %51 = sfence }
  0x1d   :  { %v59_v0 = vld [vmem:[%s456_s1] sm:$0xf]  ;;  %v60_v1 = vld [vmem:[%s456_s1 + $0x4] sm:$0xf]  ;;  %v364_v2 = vmov 0.0   ;;  %v350_v5 = vmov 0.0  }
  0x1e   :  { %57 = vst [vmem:[#allocation2] sm:$0xff] %v364_v2  ;;  %58 = vst [vmem:[#allocation2 + $0x8] sm:$0xff] %v364_v2  ;;  %v61_v3 = vld [vmem:[%s456_s1 + $0x8] sm:$0xf]  ;;  %v62_v4 = vld [vmem:[%s456_s1 + $0xc] sm:$0xf] }
  0x1f   :  { %v354_v6 = vmov 0.0   ;;  %s429_s18 = smov 0  }
  0x20 LB: > { %v254_v7 = vcombine.low %v61_v3, %v62_v4  ;;  %v365_v8 = vmov 0.0   ;;  %vm366_vm0 = vmmov 0   ;;  %v253_v9 = vcombine.low %v59_v0, %v60_v1  ;;  %s258_s1 = sshll.u32 %s360_s18, 3  ;;  %s77_s22 = sld [smem:[#allocation4 + %s360_s18]]  ;;  %s360_s18 = sphi %s429_s18, %s68_s18   ;;  %v356_v6 = vphi %v354_v6, %v355_v6   ;;  %v352_v5 = vphi %v350_v5, %v351_v5  }
  0x21   : > { %264 = vmatprep.subr.bf16.mxu0 %v365_v8  ;;  %268 = vmatprep.mubr.msk.bf16.mxu0 %vm366_vm0, %v365_v8  ;;  %s73_s21 = scalar_lea.vmem %s455_s0, %s258_s1  ;;  %vm96_vm1 = vcmask 261120   ;;  %s76_s23 = sld [smem:[#allocation6 + %s360_s18]] }
  0x22   : > { %265 = vmatpush3.bf16.msra.mxu0 %v254_v7  ;;  %v308_v10 = vld [vmem:[%s73_s21] sm:$0xff]   ;;  %s68_s18 = sadd.s32 1, %s360_s18  }
  0x23   : > { %266 = vmatprep.subr.bf16.mxu0 %v365_v8  ;;  %p65_p10 = scmp.ge.s32.totalorder %s68_s18, 64  }
  0x24   :  { %v309_v25 = vld [vmem:[%s458_s3] sm:$0xff] (%p65_p10)   ;;  %vm367_vm2 = vmmov (%p65_p10), 0   ;;  %s148_s26 = sld [smem:[#allocation3]] (%p65_p10)  ;;  %vm165_vm3 = vcmask (%p65_p10), 130048   ;;  %v218_v39 = vld [vmem:[%s457_s2 + $0x8] sm:$0xff] (%p65_p10) }
  0x25   :  { %v154_v32 = vld [vmem:[#allocation2] sm:$0xff] (%p65_p10)  ;;  %v155_v36 = vld [vmem:[#allocation2 + $0x8] sm:$0xff] (%p65_p10) }
  0x26   : > { %267 = vmatpush3.bf16.msra.mxu0 %v253_v9  ;;  %v78_v11 = vstv %s77_s22  ;;  %v217_v37 = vld [vmem:[%s457_s2] sm:$0xff] (%p65_p10) }
  0x27   : > { %v143_v14 = vstv %s76_s23  ;;  %272 = vmatprep.subr.bf16.mxu0 (%p65_p10), %v364_v2 }
  0x29   : > { %269 = vmatmul.mubr.msk.bf16.vlgmr.msra.gmra.mxu0 %vm96_vm1, %v308_v10 }
  0x2a   :  { %274 = vmatprep.mubr.msk.bf16.mxu0 (%p65_p10), %vm367_vm2, %v364_v2  ;;  %273 = vmatpush3.bf16.msra.mxu0 (%p65_p10), %v309_v25  ;;  %v149_v26 = vstv (%p65_p10), %s148_s26 }
  0xe9   : > { %v134_v12 = vpop.f32.mrf.mxu0 }
  0xea   : > { %v135_v13 = vadd.f32 %v134_v12, %v78_v11 }
  0xeb   : > { %v270_v15 = vpop.f32.mrf.mxu0 }
  0xec   : > { %v141_v16 = vmax.f32 %v135_v13, 0.0 }
  0xed   : > { %v137_v17 = vpop.f32.mrf.mxu0 }
  0xee   : > { %v144_v18 = vmul.f32 %v143_v14, %v141_v16  ;;  %v138_v19 = vadd.f32 %v137_v17, %v78_v11 }
  0xef   : > { %v271_v20 = vpop.f32.mrf.mxu0 }
  0xf0   : > { %v146_v21 = vadd.f32 %v356_v6, %v144_v18   ;;  %v142_v22 = vmax.f32 %v138_v19, 0.0 }
  0xf2   : > { %v145_v23 = vmul.f32 %v143_v14, %v142_v22  ;;  %v355_v6 = vmov %v146_v21   ;;  %67 = sbr.rel (!%p65_p10) target bundleno = 32 (0x20), region = 72  ;;  %v150_v27 = vadd.f32 (%p65_p10), %v149_v26, %v146_v21 }
  0xf4   : > { %v147_v24 = vadd.f32 %v352_v5, %v145_v23   ;;  %v152_v29 = vmax.f32 (%p65_p10), %v150_v27, 0.0 }
  0xf6   : > { %v351_v5 = vmov %v147_v24   ;;  %v151_v28 = vadd.f32 (%p65_p10), %v149_v26, %v147_v24 }
  0xf8   :  { %v153_v30 = vmax.f32 %v151_v28, 0.0 }
  0xfa   :  { %v156_v31 = vpack.c.bf16 %v153_v30, %v152_v29 }
  0xfc   :  { %275 = vmatmul.mubr.msk.bf16.vlgmr.msra.gmra.mxu0 %vm165_vm3, %v156_v31 }
 0x1bc   :  { %v203_v33 = vpop.f32.mrf.mxu0 }
 0x1bd   :  { %v210_v34 = vadd.f32 %v203_v33, %v154_v32 }
 0x1be   :  { %v276_v35 = vpop.f32.mrf.mxu0 }
 0x1bf   :  { %212 = vst [vmem:[#allocation2] sm:$0xff] %v210_v34  ;;  %v221_v42 = vmul.f32 %v217_v37, %v210_v34 }
 0x1c0   :  { %v206_v38 = vpop.f32.mrf.mxu0 }
 0x1c1   :  { %v211_v40 = vadd.f32 %v206_v38, %v155_v36 }
 0x1c2   :  { %v277_v41 = vpop.f32.mrf.mxu0 }
 0x1c3   :  { %213 = vst [vmem:[#allocation2 + $0x8] sm:$0xff] %v211_v40  ;;  %v222_v43 = vmul.f32 %v218_v39, %v211_v40 }
 0x1c5   :  { %v223_v44 = vadd.f32 %v222_v43, %v221_v42 }
 0x1c7   :  { %v224_v45 = vrot.slane %v223_v44, 4 }
 0x1c9   :  { %v225_v46 = vadd.f32 %v224_v45, %v223_v44 }
 0x1cb   :  { %v226_v47 = vrot.slane %v225_v46, 2 }
 0x1cd   :  { %v227_v48 = vadd.f32 %v226_v47, %v225_v46 }
 0x1cf   :  { %v228_v49 = vrot.slane %v227_v48, 1 }
 0x1d1   :  { %v229_v50 = vadd.f32 %v228_v49, %v227_v48 }
 0x1d3   :  { %230 = vst [vmem:[%s462_s7] sm:$0x1] %v229_v50 }
 0x1d4   :  { %235 = vsyncpa [#allocation5], 1 }
 0x1d5   :  { %236 = vsyncpa [#allocation7], 1 }

</bundles_post_ra>
